<compile_context>
chip_gen: v7x
topology: tpu7x:2x2x1
jax: 0.10.0
libtpu: 0.0.40
codegen_flags: <defaults>
</compile_context>

<pallas_src>
import math

import numpy as np
import jax
import jax.numpy as jnp
from jax.experimental import pallas as pl
from jax.experimental.pallas import tpu as pltpu


# -----------------------------------------------------------------------------
# 1-D bilinear interpolation matrix (PyTorch F.interpolate, align_corners=False)
# -----------------------------------------------------------------------------
def _bilinear_1d(out_size, in_size):
    if out_size == in_size:
        return np.eye(out_size, dtype=np.float32)
    scale = in_size / out_size
    dst = np.arange(out_size, dtype=np.float64)
    src = np.clip((dst + 0.5) * scale - 0.5, 0.0, in_size - 1.0)
    lo = np.floor(src).astype(np.int64)
    hi = np.minimum(lo + 1, in_size - 1)
    frac = (src - lo).astype(np.float32)
    m = np.zeros((out_size, in_size), dtype=np.float32)
    m[np.arange(out_size), lo] += 1.0 - frac
    m[np.arange(out_size), hi] += frac
    return m


# -----------------------------------------------------------------------------
# Fused attention kernel (one grid step = one batch block)
# -----------------------------------------------------------------------------
def _attention_kernel(x_ref, gup_ref, tw_ref, phi_ref, psi_w_ref, psi_b_ref,
                      wy_ref, attn_ref):
    # Constant weights: load once per grid step, reused across the batch block.
    tw = tw_ref[...]                 # (Ci+Cin, Cin)  bf16  (rows: [theta ; W])
    phi_w = phi_ref[...]             # (Ci, Cg)       bf16
    psi_w = psi_w_ref[...]           # (Ci, 1)        f32
    psi_b = psi_b_ref[0, 0]          # scalar         f32 (SMEM)

    bb_size, n_in, _ = x_ref.shape
    n_inter = tw.shape[0] - n_in

    for bb in range(bb_size):        # static unroll over the batch block
        x = x_ref[bb]                # (Cin, S) bf16, lane-dense S
        gup = gup_ref[bb]            # (Cg, S)  bf16 (gating signal, pre-upsampled)

        # Stacked theta(x) / W(x): one MXU push with M = Ci + Cin rows.
        tw_x = jnp.dot(tw, x, preferred_element_type=jnp.float32)   # (Ci+Cin, S)
        theta_x = tw_x[:n_inter]                                    # (Ci, S)
        w_x = tw_x[n_inter:]                                        # (Cin, S) == W @ x

        # phi on the upsampled gating signal (upsample and 1x1 conv commute).
        phi_up = jnp.dot(phi_w, gup, preferred_element_type=jnp.float32)  # (Ci, S)

        # f = relu(theta_x + phi_up); psi is a sublane reduction (depthwise scale
        # folded into the pointwise weight at init) plus an SMEM scalar bias.
        f = jnp.maximum(theta_x + phi_up, 0.0)
        logits = jnp.sum(f * psi_w, axis=0, keepdims=True) + psi_b        # (1, S)

        # mode == 'concatenation_softmax': softmax over the flattened spatial axis
        # (fully lane-dense, f32, exact normalisation).
        m = jnp.max(logits, axis=1, keepdims=True)
        e = jnp.exp(logits - m)
        attn = e / jnp.sum(e, axis=1, keepdims=True)                      # (1, S)

        # W(attn * x) == attn * (W x): gating applied after the W matmul.
        wy_ref[bb] = (w_x * attn).astype(wy_ref.dtype)
        attn_ref[bb] = attn.astype(attn_ref.dtype)


def _pick_batch_block(B):
    """Batches per grid step: amortize per-step overhead for larger B while
    keeping >= 2 grid steps on the parallel axis (both v7x TensorCores)."""
    if B < 4:
        return 1
    for bb in (4, 3, 2):
        if B % bb == 0 and B // bb >= 2:
            return bb
    return 1


def _attention_pallas(x_flat, gup_flat, tw_stack, phi_w, psi_w, psi_b):
    B, Cin, S = x_flat.shape
    _, Cg, _ = gup_flat.shape
    Ci = phi_w.shape[0]
    BB = _pick_batch_block(B)

    return pl.pallas_call(
        _attention_kernel,
        out_shape=(jax.ShapeDtypeStruct((B, Cin, S), jnp.bfloat16),
                   jax.ShapeDtypeStruct((B, 1, S), jnp.bfloat16)),
        grid=(B // BB,),
        in_specs=[
            pl.BlockSpec((BB, Cin, S), lambda b: (b, 0, 0)),     # x (channels-first)
            pl.BlockSpec((BB, Cg, S), lambda b: (b, 0, 0)),      # upsampled g
            pl.BlockSpec((Ci + Cin, Cin), lambda b: (0, 0)),     # stacked [theta ; W]
            pl.BlockSpec((Ci, Cg), lambda b: (0, 0)),            # phi_eff
            pl.BlockSpec((Ci, 1), lambda b: (0, 0)),             # fused psi weight column
            pl.BlockSpec(memory_space=pltpu.MemorySpace.SMEM),   # fused psi bias scalar
        ],
        out_specs=(pl.BlockSpec((BB, Cin, S), lambda b: (b, 0, 0)),
                   pl.BlockSpec((BB, 1, S), lambda b: (b, 0, 0))),
        compiler_params=pltpu.CompilerParams(dimension_semantics=("parallel",)),
    )(x_flat, gup_flat, tw_stack, phi_w, psi_w, psi_b)


# -----------------------------------------------------------------------------
# Module wrapper (deterministic synthetic parameters)
# -----------------------------------------------------------------------------
def _normal(key, shape, std):
    return std * jax.random.normal(key, shape, dtype=jnp.float32)


class GridAttentionBlock2DTORRPallas:
    """Pallas port of _GridAttentionBlockND_TORR (dimension=2,
    mode='concatenation_softmax', sub_sample_factor=(1,1), bn_layer=False)."""

    def __init__(self, in_channels, gating_channels, inter_channels=None, *, key):
        if inter_channels is None:
            inter_channels = in_channels // 2
            if inter_channels == 0:
                inter_channels = 1
        self.in_channels = in_channels
        self.gating_channels = gating_channels
        self.inter_channels = inter_channels

        Cin, Cg, Ci = in_channels, gating_channels, inter_channels
        ks = jax.random.split(key, 9)

        # init matches the module: conv weights ~ N(0, sqrt(2/(kh*kw*out_ch)))
        theta_dw = _normal(ks[0], (Cin,), math.sqrt(2.0 / Cin))    # depthwise 1x1
        theta_pw = _normal(ks[1], (Ci, Cin), math.sqrt(2.0 / Ci))  # pointwise
        phi_dw = _normal(ks[2], (Cg,), math.sqrt(2.0 / Cg))
        phi_pw = _normal(ks[3], (Ci, Cg), math.sqrt(2.0 / Ci))
        psi_dw = _normal(ks[4], (Ci,), math.sqrt(2.0 / Ci))
        # conv biases keep PyTorch's default U(-1/sqrt(fan_in), 1/sqrt(fan_in)); fan_in=1 here
        psi_dw_b = jax.random.uniform(ks[5], (Ci,), minval=-1.0, maxval=1.0,
                                      dtype=jnp.float32)
        psi_pw = _normal(ks[6], (1, Ci), math.sqrt(2.0 / 1.0))
        psi_pw_b = jnp.float32(10.0)   # mode='concatenation_softmax' -> psi bias = 10
        w_dw = _normal(ks[7], (Cin,), math.sqrt(2.0 / Cin))
        w_pw = _normal(ks[8], (Cin, Cin), math.sqrt(2.0 / Cin))

        # Fuse each 1x1 SeparableConv2d (depthwise scale + pointwise matmul) into a
        # single channel-mixing matrix for channels-first matmuls.
        theta_w = theta_pw * theta_dw[None, :]                      # (Ci, Cin)
        w_w = w_pw * w_dw[None, :]                                  # (Cin, Cin)
        # Stack [theta ; W] so the kernel issues one matmul against x (bf16 MXU).
        self.tw_stack = jnp.concatenate([theta_w, w_w], axis=0).astype(jnp.bfloat16)
        self.phi_w = (phi_pw * phi_dw[None, :]).astype(jnp.bfloat16)  # (Ci, Cg)
        # psi: (f*s + b) @ pw^T + 10  ==  f @ (s*pw)^T + (b@pw^T + 10)
        self.psi_w = (psi_dw * psi_pw[0]).reshape(Ci, 1)                       # (Ci, 1) f32
        self.psi_b = (jnp.sum(psi_dw_b * psi_pw[0]) + psi_pw_b).reshape(1, 1)  # (1, 1) f32

        self._interp_cache = {}   # (H, W, Hg, Wg) -> (Ah, Aw) device constants

    def _interp_mats(self, H, W, Hg, Wg):
        key = (H, W, Hg, Wg)
        if key not in self._interp_cache:
            self._interp_cache[key] = (jnp.asarray(_bilinear_1d(H, Hg)),   # (H, Hg)
                                       jnp.asarray(_bilinear_1d(W, Wg)))   # (W, Wg)
        return self._interp_cache[key]

    def _prepare(self, x, g):
        """Flatten x and separably upsample g (cached 1-D matrices); bf16 kernel I/O."""
        B, Cin, H, W = x.shape
        _, Cg, Hg, Wg = g.shape
        Ah, Aw = self._interp_mats(H, W, Hg, Wg)
        hp = jax.lax.Precision.HIGHEST
        # Separable bilinear upsample of the gating signal (width, then height).
        gw = jnp.einsum('bchw,Ww->bchW', g.astype(jnp.float32), Aw, precision=hp)
        gup = jnp.einsum('bchW,Hh->bcHW', gw, Ah, precision=hp)
        x_flat = x.reshape(B, Cin, H * W).astype(jnp.bfloat16)
        gup_flat = gup.reshape(B, Cg, H * W).astype(jnp.bfloat16)
        return x_flat, gup_flat

    def forward(self, x, g):
        """x: (B, Cin, H, W) NCHW, g: (B, Cg, Hg, Wg) NCHW.
        Returns (W_y, sigm_psi_f) with shapes (B, Cin, H, W), (B, 1, H, W), bf16."""
        B, Cin, H, W = x.shape
        Bg = g.shape[0]
        assert B == Bg

        x_flat, gup_flat = self._prepare(x, g)
        w_y, attn = _attention_pallas(x_flat, gup_flat, self.tw_stack, self.phi_w,
                                      self.psi_w, self.psi_b)

        # Second F.interpolate in the reference resizes (H,W)->(H,W) (stride=1),
        # i.e. identity, so it is omitted.
        return w_y.reshape(B, Cin, H, W), attn.reshape(B, 1, H, W)


# -----------------------------------------------------------------------------
# Pure-JAX reference (sanity check of the Pallas kernel; uses the same
# bf16-rounded inputs/weights so the comparison isolates kernel correctness)
# -----------------------------------------------------------------------------
def _reference(block, x, g):
    B, Cin, H, W = x.shape
    hp = jax.lax.Precision.HIGHEST
    x_flat, gup_flat = block._prepare(x, g)
    xf = x_flat.astype(jnp.float32)
    gf = gup_flat.astype(jnp.float32)
    tw = block.tw_stack.astype(jnp.float32)
    phi_w = block.phi_w.astype(jnp.float32)
    Ci = phi_w.shape[0]

    tw_x = jnp.einsum('oc,bcs->bos', tw, xf, precision=hp)
    theta_x, w_x = tw_x[:, :Ci], tw_x[:, Ci:]
    phi_up = jnp.einsum('ic,bcs->bis', phi_w, gf, precision=hp)
    f = jnp.maximum(theta_x + phi_up, 0.0)
    logits = jnp.einsum('bis,i->bs', f, block.psi_w[:, 0], precision=hp) + block.psi_b[0, 0]
    attn = jax.nn.softmax(logits, axis=-1)                          # (B, S)
    wy = w_x * attn[:, None, :]
    return wy.reshape(B, Cin, H, W), attn.reshape(B, 1, H, W)


if __name__ == "__main__":
    key = jax.random.PRNGKey(0)
    k_param, k_x, k_g = jax.random.split(key, 3)

    B, Cin, H, W = 2, 4, 16, 16      # x: (b, in_channels, h, w)
    Cg, Hg, Wg = 8, 8, 8             # g: (b, gating_channels, hg, wg)

    block = GridAttentionBlock2DTORRPallas(in_channels=Cin, gating_channels=Cg,
                                           key=k_param)
    x = jax.random.normal(k_x, (B, Cin, H, W), dtype=jnp.float32)
    g = jax.random.normal(k_g, (B, Cg, Hg, Wg), dtype=jnp.float32)

    w_y, attn = block.forward(x, g)
    jax.block_until_ready((w_y, attn))

    assert w_y.shape == (B, Cin, H, W)
    assert attn.shape == (B, 1, H, W)

    ref_wy, ref_attn = _reference(block, x, g)
    # Tolerance covers only the bf16 rounding of the kernel outputs (internal
    # math is f32-accumulated against identical bf16 operands).
    assert jnp.allclose(attn.astype(jnp.float32), ref_attn, rtol=1e-2, atol=1e-4)
    assert jnp.allclose(w_y.astype(jnp.float32), ref_wy, rtol=1e-2, atol=1e-4)

    print("KERNEL_OK")
</pallas_src>

<mosaic_0001>
module attributes {stable_mosaic.version = 11 : i64} {
  func.func @_attention_kernel(%arg0: i32, %arg1: memref<1x4x256xbf16, #tpu.memory_space<vmem>>, %arg2: memref<1x8x256xbf16, #tpu.memory_space<vmem>>, %arg3: memref<6x4xbf16, #tpu.memory_space<vmem>>, %arg4: memref<2x8xbf16, #tpu.memory_space<vmem>>, %arg5: memref<2x1xf32, #tpu.memory_space<vmem>>, %arg6: memref<1x1xf32, #tpu.memory_space<smem>>, %arg7: memref<1x4x256xbf16, #tpu.memory_space<vmem>>, %arg8: memref<1x1x256xbf16, #tpu.memory_space<vmem>>) attributes {dimension_semantics = [#tpu.dimension_semantics<parallel>], iteration_bounds = array<i64: 2>, scalar_prefetch = 0 : i64, scratch_operands = 0 : i64, tpu.core_type = #tpu.core_type<tc>, window_params = [{transform_indices = @transform_0, window_bounds = array<i64: 1, 4, 256>}, {transform_indices = @transform_1, window_bounds = array<i64: 1, 8, 256>}, {pipeline_mode = #tpu.pipeline_mode<synchronous>, transform_indices = @transform_2, window_bounds = array<i64: 6, 4>}, {pipeline_mode = #tpu.pipeline_mode<synchronous>, transform_indices = @transform_3, window_bounds = array<i64: 2, 8>}, {pipeline_mode = #tpu.pipeline_mode<synchronous>, transform_indices = @transform_4, window_bounds = array<i64: 2, 1>}, {transform_indices = @transform_5, window_bounds = array<i64: 1, 1>}, {transform_indices = @transform_6, window_bounds = array<i64: 1, 4, 256>}, {transform_indices = @transform_7, window_bounds = array<i64: 1, 1, 256>}]} {
    %c0 = arith.constant 0 : index
    %c0_0 = arith.constant 0 : index
    %0 = vector.load %arg3[%c0, %c0_0] : memref<6x4xbf16, #tpu.memory_space<vmem>>, vector<6x4xbf16>
    %c0_1 = arith.constant 0 : index
    %c0_2 = arith.constant 0 : index
    %1 = vector.load %arg4[%c0_1, %c0_2] : memref<2x8xbf16, #tpu.memory_space<vmem>>, vector<2x8xbf16>
    %c0_3 = arith.constant 0 : index
    %c0_4 = arith.constant 0 : index
    %2 = vector.load %arg5[%c0_3, %c0_4] : memref<2x1xf32, #tpu.memory_space<vmem>>, vector<2x1xf32>
    %c0_5 = arith.constant 0 : index
    %c0_6 = arith.constant 0 : index
    %3 = memref.load %arg6[%c0_5, %c0_6] : memref<1x1xf32, #tpu.memory_space<smem>>
    %c0_7 = arith.constant 0 : index
    %c0_8 = arith.constant 0 : index
    %c0_9 = arith.constant 0 : index
    %4 = vector.load %arg1[%c0_7, %c0_8, %c0_9] : memref<1x4x256xbf16, #tpu.memory_space<vmem>>, vector<1x4x256xbf16>
    %5 = vector.shape_cast %4 : vector<1x4x256xbf16> to vector<4x256xbf16>
    %c0_10 = arith.constant 0 : index
    %c0_11 = arith.constant 0 : index
    %c0_12 = arith.constant 0 : index
    %6 = vector.load %arg2[%c0_10, %c0_11, %c0_12] : memref<1x8x256xbf16, #tpu.memory_space<vmem>>, vector<1x8x256xbf16>
    %7 = vector.shape_cast %6 : vector<1x8x256xbf16> to vector<8x256xbf16>
    %cst = arith.constant dense<0.000000e+00> : vector<6x256xf32>
    %8 = tpu.matmul %0, %5, %cst {dimension_numbers = #tpu.dot_dimension_numbers<[1], [0], [0], [1], [0, 0, 1, 1], [], []>} : vector<6x4xbf16>, vector<4x256xbf16>, vector<6x256xf32> -> vector<6x256xf32>
    %9 = vector.extract_strided_slice %8 {offsets = [0, 0], sizes = [2, 256], strides = [1, 1]} : vector<6x256xf32> to vector<2x256xf32>
    %10 = vector.extract_strided_slice %8 {offsets = [2, 0], sizes = [4, 256], strides = [1, 1]} : vector<6x256xf32> to vector<4x256xf32>
    %cst_13 = arith.constant dense<0.000000e+00> : vector<2x256xf32>
    %11 = tpu.matmul %1, %7, %cst_13 {dimension_numbers = #tpu.dot_dimension_numbers<[1], [0], [0], [1], [0, 0, 1, 1], [], []>} : vector<2x8xbf16>, vector<8x256xbf16>, vector<2x256xf32> -> vector<2x256xf32>
    %12 = arith.addf %9, %11 : vector<2x256xf32>
    %cst_14 = arith.constant 0.000000e+00 : f32
    %13 = vector.broadcast %cst_14 : f32 to vector<2x256xf32>
    %14 = arith.maximumf %12, %13 : vector<2x256xf32>
    %15 = vector.broadcast %2 : vector<2x1xf32> to vector<2x256xf32>
    %16 = arith.mulf %14, %15 : vector<2x256xf32>
    %cst_15 = arith.constant dense<0.000000e+00> : vector<256xf32>
    %17 = vector.multi_reduction <add>, %16, %cst_15 [0] : vector<2x256xf32> to vector<256xf32>
    %18 = vector.shape_cast %17 : vector<256xf32> to vector<1x256xf32>
    %19 = vector.broadcast %3 : f32 to vector<1x256xf32>
    %20 = arith.addf %18, %19 : vector<1x256xf32>
    %cst_16 = arith.constant dense<0xFF800000> : vector<1xf32>
    %21 = vector.multi_reduction <maximumf>, %20, %cst_16 [1] : vector<1x256xf32> to vector<1xf32>
    %22 = vector.shape_cast %21 : vector<1xf32> to vector<1x1xf32>
    %23 = vector.broadcast %22 : vector<1x1xf32> to vector<1x256xf32>
    %24 = arith.subf %20, %23 : vector<1x256xf32>
    %25 = math.exp %24 : vector<1x256xf32>
    %cst_17 = arith.constant dense<0.000000e+00> : vector<1xf32>
    %26 = vector.multi_reduction <add>, %25, %cst_17 [1] : vector<1x256xf32> to vector<1xf32>
    %27 = vector.shape_cast %26 : vector<1xf32> to vector<1x1xf32>
    %28 = vector.broadcast %27 : vector<1x1xf32> to vector<1x256xf32>
    %29 = arith.divf %25, %28 : vector<1x256xf32>
    %30 = vector.broadcast %29 : vector<1x256xf32> to vector<4x256xf32>
    %31 = arith.mulf %10, %30 : vector<4x256xf32>
    %32 = arith.truncf %31 : vector<4x256xf32> to vector<4x256xbf16>
    %c0_18 = arith.constant 0 : index
    %c0_19 = arith.constant 0 : index
    %c0_20 = arith.constant 0 : index
    %33 = vector.load %arg7[%c0_18, %c0_19, %c0_20] : memref<1x4x256xbf16, #tpu.memory_space<vmem>>, vector<1x4x256xbf16>
    %34 = vector.shape_cast %33 : vector<1x4x256xbf16> to vector<4x256xbf16>
    %35 = vector.shape_cast %32 : vector<4x256xbf16> to vector<1x4x256xbf16>
    tpu.vector_store %arg7[%c0_18, %c0_19, %c0_20], %35 {strides = array<i32>} : memref<1x4x256xbf16, #tpu.memory_space<vmem>>, vector<1x4x256xbf16>,
    %36 = arith.truncf %29 : vector<1x256xf32> to vector<1x256xbf16>
    %c0_21 = arith.constant 0 : index
    %c0_22 = arith.constant 0 : index
    %c0_23 = arith.constant 0 : index
    %37 = vector.load %arg8[%c0_21, %c0_22, %c0_23] : memref<1x1x256xbf16, #tpu.memory_space<vmem>>, vector<1x1x256xbf16>
    %38 = vector.shape_cast %37 : vector<1x1x256xbf16> to vector<1x256xbf16>
    %39 = vector.shape_cast %36 : vector<1x256xbf16> to vector<1x1x256xbf16>
    tpu.vector_store %arg8[%c0_21, %c0_22, %c0_23], %39 {strides = array<i32>} : memref<1x1x256xbf16, #tpu.memory_space<vmem>>, vector<1x1x256xbf16>,
    return
  }
  func.func @transform_0(%arg0: i32) -> (i32, i32, i32) {
    %c0_i32 = arith.constant 0 : i32
    %c0_i32_0 = arith.constant 0 : i32
    %c0_i32_1 = arith.constant 0 : i32
    return %arg0, %c0_i32, %c0_i32_0 : i32, i32, i32
  }
  func.func @transform_1(%arg0: i32) -> (i32, i32, i32) {
    %c0_i32 = arith.constant 0 : i32
    %c0_i32_0 = arith.constant 0 : i32
    %c0_i32_1 = arith.constant 0 : i32
    return %arg0, %c0_i32, %c0_i32_0 : i32, i32, i32
  }
  func.func @transform_2(%arg0: i32) -> (i32, i32) {
    %c0_i32 = arith.constant 0 : i32
    %c0_i32_0 = arith.constant 0 : i32
    %c0_i32_1 = arith.constant 0 : i32
    return %c0_i32, %c0_i32_0 : i32, i32
  }
  func.func @transform_3(%arg0: i32) -> (i32, i32) {
    %c0_i32 = arith.constant 0 : i32
    %c0_i32_0 = arith.constant 0 : i32
    %c0_i32_1 = arith.constant 0 : i32
    return %c0_i32, %c0_i32_0 : i32, i32
  }
  func.func @transform_4(%arg0: i32) -> (i32, i32) {
    %c0_i32 = arith.constant 0 : i32
    %c0_i32_0 = arith.constant 0 : i32
    %c0_i32_1 = arith.constant 0 : i32
    return %c0_i32, %c0_i32_0 : i32, i32
  }
  func.func @transform_5(%arg0: i32) -> (i32, i32) {
    %c0_i32 = arith.constant 0 : i32
    %c0_i32_0 = arith.constant 0 : i32
    %c0_i32_1 = arith.constant 0 : i32
    return %c0_i32, %c0_i32_0 : i32, i32
  }
  func.func @transform_6(%arg0: i32) -> (i32, i32, i32) {
    %c0_i32 = arith.constant 0 : i32
    %c0_i32_0 = arith.constant 0 : i32
    %c0_i32_1 = arith.constant 0 : i32
    return %arg0, %c0_i32, %c0_i32_0 : i32, i32, i32
  }
  func.func @transform_7(%arg0: i32) -> (i32, i32, i32) {
    %c0_i32 = arith.constant 0 : i32
    %c0_i32_0 = arith.constant 0 : i32
    %c0_i32_1 = arith.constant 0 : i32
    return %arg0, %c0_i32, %c0_i32_0 : i32, i32, i32
  }
}

</mosaic_0001>

<bundles_post_ra>
// kernel: tpu_custom_call.1
= control target key start
LH: loop header
LB: loop body
LE: loop exit
PB: predicated region body
PF: predicated region fallthrough
CT: control target
= control target key end

     0   :  { %s1120_s0 = inlined_call_operand.hbm [shape: bf16[2,4,256], index: 0, kind: input, shape index: {}]   ;;  %s1121_s1 = inlined_call_operand.vmem [shape: bf16[2,8,256], index: 1, kind: input, shape index: {}]   ;;  %s1122_s2 = inlined_call_operand.vmem [shape: bf16[6,4], index: 2, kind: input, shape index: {}]   ;;  %s1123_s3 = inlined_call_operand.vmem [shape: bf16[2,8], index: 3, kind: input, shape index: {}]   ;;  %s1124_s4 = inlined_call_operand.vmem [shape: f32[2,1], index: 4, kind: input, shape index: {}]   ;;  %s1125_s5 = inlined_call_operand.<no memory space> [shape: f32[1,1], index: 5, kind: input, shape index: {}]   ;;  %s1126_s6 = inlined_call_operand.hbm [shape: bf16[2,4,256], index: 6, kind: output, shape index: {0}]   ;;  %s1127_s7 = inlined_call_operand.vmem [shape: bf16[2,1,256], index: 7, kind: output, shape index: {1}]  }
   0x1   :  { %13 = sst [smem:[#allocation2]] %s1125_s5 }
   0x2   :  { %14 = vsyncpa [#allocation4], 0 }
   0x3   :  { %16 = vsyncpa [#allocation4 + $0x1], 0 }
   0x4   :  { %17 = vsyncpa [#allocation5], 0 }
   0x5   :  { %19 = vsyncpa [#allocation5 + $0x1], 0  ;;  %s914_s26 = smov 0   ;;  %s916_s27 = smov 0  }
   0x6   :  { %s918_s28 = smov 0   ;;  %s920_s29 = smov 0  }
   0x7 LB: > { %s935_s5 = sadd.s32 4294967295, %s864_s29   ;;  %s680_s30 = sadd.s32 4294967294, %s864_s29   ;;  %s864_s29 = sphi %s920_s29, %s1144_s29   ;;  %s860_s28 = sphi %s918_s28, %s1143_s28   ;;  %s856_s27 = sphi %s916_s27, %s1142_s27   ;;  %s852_s26 = sphi %s914_s26, %s1141_s26  }
   0x8   : > { %s939_s8 = sadd.s32 1, %s864_s29   ;;  %s32_s9 = sadd.s32 1, %s860_s28 }
   0x9   : > { %s29_s10 = ssub.s32 %s864_s29, %s939_s8  ;;  %p39_p0 = scmp.ne.s32.totalorder %s860_s28, %s856_s27 }
   0xa   : > { %p30_p1 = scmp.eq.s32.totalorder %s29_s10, 0  ;;  %p40_p2 = scmp.eq.s32.totalorder %s864_s29, 0 }
   0xb   : > { %p45_p3 = scmp.ne.s32.totalorder %s856_s27, %s852_s26  ;;  %p46_p4 = scmp.eq.s32.totalorder %s935_s5, 0 }
   0xc   : > { %s951_s11 = scalar_select %p30_p1, %s860_s28, %s32_s9  }
   0xd   : > { %p953_p5 = por %p40_p2, %p39_p0  ;;  %p957_p6 = por %p46_p4, %p45_p3 }
   0xe   : > { %p179_p7 = scmp.eq.s32.totalorder %s935_s5, 1  ;;  %p185_p8 = scmp.eq.s32.totalorder %s680_s30, 1 }
   0xf   : > { %p722_p10 = scmp.lt.s32.totalorder %s864_s29, 2  ;;  %s243_s16 = sand.u32 1, %s860_s28  }
  0x10   : > { %p964_p11 = por %p179_p7, %p39_p0  ;;  %p968_p12 = por %p185_p8, %p45_p3 }
  0x11   : > { %s707_s17 = sshll.u32 %s864_s29, 6  ;;  %s683_s18 = sshll.u32 %s243_s16, 2 }
  0x12   : > { %s1131_s14 = scalar_select %p964_p11, 1, 0 }
  0x13   : > { %s1132_s15 = scalar_select %p968_p12, 1, 0 }
  0x14   : > { %s977_s21 = scalar_lea.hbm %s1120_s0, %s707_s17  ;;  %s247_s22 = scalar_lea.vmem [#allocation3], %s683_s18 }
  0x15   : > { %s255_s23 = sshll.u32 %s247_s22, 4  ;;  %p981_p13 = pnand %p722_p10, %p953_p5  ;;  %s985_s23 = int_to_ptr.vmem [resolvable:$true] %s255_s23 }
  0x16   : > { %s244_s25 = scalar_lea.sflag [#allocation4], %s243_s16  ;;  %s768_s30 = scalar_lea.hbm %s977_s21, 64 }
  0x17   : > { %p769_p2 = scmp.ne.s32.totalorder %s977_s21, %s768_s30  ;;  %p770_p3 = pneg %p981_p13 }
  0x18   : > { %s773_s12 = scalar_lea.hbm %s1120_s0, 128  ;;  %p774_p5 = scmp.lt.u32.totalorder %s977_s21, %s1120_s0 }
  0x19   : > { %p771_p4 = pnand %p770_p3, %p769_p2  ;;  %p775_p8 = scmp.lt.u32.totalorder %s773_s12, %s768_s30 }
  0x1a   : > { %p777_p9 = scmp.lt.u32.totalorder %s768_s30, %s977_s21 }
  0x1b   : > { %p772_p7 = pneg %p771_p4  ;;  %p776_p10 = por %p775_p8, %p774_p5 }
  0x1d   : > { %p778_p0 = por %p777_p9, %p776_p10 }
  0x1f   : > { %p779_p1 = pnand %p778_p0, %p772_p7 }
  0x21   : > { %782 = shalt.err (!%p779_p1)
}
  0x22   : > { %s783_s16 = scalar_lea.vmem %s985_s23, 64  ;;  %s866_s19 = smov [#allocation3]  }
  0x23   : > { %p784_p2 = scmp.ne.s32.totalorder %s985_s23, %s783_s16  ;;  %s788_s20 = sshll.u32 %s866_s19, 4  ;;  %s789_s20 = int_to_ptr.vmem [resolvable:$false] %s788_s20 }
  0x24   : > { %s790_s22 = scalar_lea.vmem %s789_s20, 128  ;;  %p791_p11 = scmp.lt.s32.totalorder %s985_s23, %s789_s20 }
  0x25   : > { %p786_p4 = pnand %p784_p2, %p770_p3  ;;  %p792_p5 = scmp.lt.s32.totalorder %s790_s22, %s783_s16 }
  0x27   : > { %p787_p12 = pneg %p786_p4  ;;  %p793_p8 = por %p792_p5, %p791_p11 }
  0x29   : > { %p794_p9 = pnand %p793_p8, %p787_p12 }
  0x2b   : > { %797 = shalt.err (!%p794_p9)
}
  0x2c   : > { %717 = dma.hbm_to_vmem [thread:$0]  (!%p981_p13), %s977_s21, 64, %s985_s23, %s244_s25  }
  0x2d   : > { %p1134_p0 = scmp.lt.s32.totalorder %s864_s29, 3  ;;  %p1135_p1 = scmp.ge.s32.totalorder %s864_s29, 1 }
  0x2f   : > { %p269_p3 = pnand %p1135_p1, %p1134_p0 }
  0x30   : > { %s1019_s30 = sand.u32 (!%p269_p3), 1, %s856_s27  }
  0x31   : > { %272 = sbr.rel (%p269_p3) target bundleno = 646 (0x286), region = 44  ;;  %s687_s9 = sshll.u32 (!%p269_p3), %s1019_s30, 2 }
  0x32   : > { %s275_s10 = scalar_lea.sflag (!%p269_p3), [#allocation4], %s1019_s30  ;;  %s278_s24 = scalar_lea.vmem (!%p269_p3), [#allocation3], %s687_s9 }
  0x38   : > { %843 = dma.done.wait (%p957_p6), %s275_s10, 64  }
  0x39   : > { %845 = vsyncadd (%p957_p6), %s275_s10, 4294967232  ;;  %p318_p11 = scmp.lt.s32.totalorder %s935_s5, 1  ;;  %v867_v0 = vmov 0   ;;  %vm347_vm0 = vcmask 1041408   ;;  %vm404_vm1 = vcmask 1043456   ;;  %vm343_vm2 = vcmask 31744  }
  0x3a   : > { %386 = vmatprep.mubr.bf16.mxu0 %v867_v0  ;;  %443 = vmatprep.mubr.bf16.mxu1 %v867_v0  ;;  %v692_v1 = vld.sshfl [vmem:[%s278_s24] sm:$0x33 pattern:$0x76325410]  ;;  %vm400_vm3 = vcmask 64512   ;;  %s331_s10 = sld [smem:[#allocation2]]  ;;  %v505_v53 = vlaneseq }
  0x3b   : > { %s1031_s21 = scalar_select %p318_p11, %s935_s5, 1  ;;  %759 = vset.pattern.permute.xlu0 %v867_v0  ;;  %v342_v3 = vcombine.high %v692_v1, %v692_v1  ;;  %v349_v5 = vsel %vm347_vm0, %v692_v1, 0  ;;  %v330_v7 = vld [vmem:[%s1124_s4] sm:$0x3]  ;;  %v868_v54 = vmov 1966171168  }
  0x3c   : > { %v328_v9 = vld [vmem:[%s1122_s2] sm:$0x7]  ;;  %458 = vperm.xlu0 %759, %v330_v7   ;;  %v529_v55 = vunpack.c.l.s4 %v868_v54  ;;  %v869_v56 = vmov 1983009808   ;;  %v506_v58 = vshrl.u32 %v505_v53, 7  ;;  %vm510_vm4 = vcmask 1040384  }
  0x3d   : > { %s708_s23 = sshll.u32 %s1031_s21, 3  ;;  %693 = vmatprep.subr.msk.bf16.mxu0 %vm347_vm0, %v342_v3  ;;  %v329_v10 = vld [vmem:[%s1123_s3] sm:$0x1]  ;;  %v503_v57 = vunpack.c.l.s4 %v869_v56  ;;  %vm543_vm5 = vsmask.f32 256  ;;  %s691_s24 = sshll.u32 %s1031_s21, 1 }
  0x3e   : > { %s322_s17 = scalar_lea.vmem %s1121_s1, %s708_s23  ;;  %355 = vmatpush1.bf16.msra.mxu0 %v349_v5  ;;  %v530_v59 = vunpack.c.0.s8 %v529_v55  ;;  %vm545_vm6 = vcmask 1041409   ;;  %vm546_vm7 = vsmask.f32 1280  ;;  %vm511_vm8 = vcmask 1042434   ;;  %vm1058_vm9 = vmand %vm510_vm4, %vm543_vm5  ;;  %s326_s12 = scalar_lea.vmem %s1127_s7, %s691_s24 }
  0x3f   : > { %v333_v2 = vld [vmem:[%s322_s17] sm:$0xff]  ;;  %v504_v60 = vunpack.c.0.s8 %v503_v57  ;;  %vm547_vm10 = vmand %vm545_vm6, %vm546_vm7  ;;  %vm513_vm12 = vcmask 1044484   ;;  %vm515_vm15 = vcmask 1046534   ;;  %s709_s21 = sshll.u32 %s935_s5, 6  ;;  %s311_s17 = scalar_lea.vmem [#allocation6], %s687_s9 }
  0x40   : > { %v696_v4 = vcombine.high %v333_v2, %v333_v2  ;;  %v695_v6 = vcombine.low %v333_v2, %v333_v2  ;;  %v477_v38 = vstv %s331_s10  ;;  %v533_v62 = vsub.s32 %v530_v59, %v506_v58  ;;  %vm512_vm11 = vmor %vm510_vm4, %vm511_vm8  ;;  %s571_s13 = sshll.u32 %s311_s17, 4  ;;  %s1076_s19 = scalar_lea.hbm %s1126_s6, %s709_s21  ;;  %s1078_s13 = int_to_ptr.vmem [resolvable:$true] %s571_s13 }
  0x41   : > { %694 = vmatmul.mubr.msk.bf16.vlgmr.msra.gmra.mrb[0].mxu0 %vm343_vm2, %v328_v9  ;;  %v507_v5 = vsub.s32 %v504_v60, %v506_v58  ;;  %vm548_vm13 = vmor %vm547_vm10, %vm1058_vm9  ;;  %s553_s5 = scalar_lea.sflag [#allocation5], %s1019_s30  ;;  %s798_s20 = scalar_lea.vmem %s1078_s13, 64 }
  0x42   : > { %697 = vmatprep.subr.msk.bf16.mxu1 %vm404_vm1, %v696_v4  ;;  %v406_v8 = vsel %vm404_vm1, %v695_v6, 0  ;;  %vm514_vm14 = vmor %vm512_vm11, %vm513_vm12  ;;  %p799_p6 = scmp.ne.s32.totalorder %s1078_s13, %s798_s20  ;;  %p1138_p12 = scmp.ne.s32.totalorder %s1131_s14, 0 }
  0x43   : > { %412 = vmatpush1.bf16.msra.mxu1 %v406_v8  ;;  %v549_v8 = vld [vmem:[%s326_s12] sm:$0x3]  ;;  %s870_s9 = smov [#allocation6]  }
  0x44   : > { %p800_p13 = pnand %p799_p6, %p1138_p12  ;;  %s802_s22 = sshll.u32 %s870_s9, 4  ;;  %s803_s22 = int_to_ptr.vmem [resolvable:$false] %s802_s22 }
  0x45   : > { %s804_s10 = scalar_lea.vmem %s803_s22, 128  ;;  %p805_p10 = scmp.lt.s32.totalorder %s1078_s13, %s803_s22 }
  0x46   : > { %698 = vmatmul.mubr.msk.bf16.vlgmr.msra.gmra.mrb[0].mxu1 %vm400_vm3, %v329_v10  ;;  %p801_p7 = pneg %p800_p13  ;;  %p806_p2 = scmp.lt.s32.totalorder %s804_s10, %s798_s20 }
  0x48   : > { %p807_p4 = por %p806_p2, %p805_p10 }
  0x4a   : > { %p808_p5 = pnand %p807_p4, %p801_p7 }
  0xbb   : > { %v459_v11 = vpop.permute.xlu0 %458 }
 0x114   : > { %v1048_v12 = vpop.f32.mrb[0].mxu0 }
 0x115   : > { %v1051_v15 = vpop.f32.mrb[1].mxu0 }
 0x116   : > { %v392_v18 = vpop.f32.mrb[2].mxu0 }
 0x117   : > { %v393_v21 = vpop.f32.mrb[3].mxu0 }
 0x119   : > { %v445_v13 = vpop.f32.mrb[0].mxu1 }
 0x11a   : > { %v452_v14 = vadd.f32 %v445_v13, %v1048_v12  ;;  %v447_v16 = vpop.f32.mrb[1].mxu1 }
 0x11b   : > { %v453_v17 = vadd.f32 %v447_v16, %v1051_v15  ;;  %v449_v19 = vpop.f32.mrb[2].mxu1 }
 0x11c   : > { %v454_v20 = vmax.f32 %v452_v14, 0.0  ;;  %v450_v22 = vpop.f32.mrb[3].mxu1 }
 0x11d   : > { %v455_v23 = vmax.f32 %v453_v17, 0.0 }
 0x11e   : > { %v461_v24 = vmul.f32 %v459_v11, %v454_v20 }
 0x11f   : > { %v462_v25 = vmul.f32 %v459_v11, %v455_v23 }
 0x120   : > { %v463_v26 = vsel %vm347_vm0, %v461_v24, 0.0 }
 0x121   : > { %v464_v27 = vrot.slane %v463_v26, 4  ;;  %v470_v28 = vsel %vm347_vm0, %v462_v25, 0.0  ;;  %vm516_vm0 = vmor %vm514_vm14, %vm515_vm15 }
 0x122   : > { %v471_v29 = vrot.slane %v470_v28, 4 }
 0x123   : > { %v465_v30 = vadd.f32 %v464_v27, %v463_v26 }
 0x124   : > { %v472_v31 = vadd.f32 %v471_v29, %v470_v28 }
 0x125   : > { %v466_v32 = vrot.slane %v465_v30, 2 }
 0x126   : > { %v473_v33 = vrot.slane %v472_v31, 2 }
 0x127   : > { %v467_v34 = vadd.f32 %v466_v32, %v465_v30 }
 0x128   : > { %v474_v35 = vadd.f32 %v473_v33, %v472_v31 }
 0x129   : > { %v468_v36 = vrot.slane %v467_v34, 1 }
 0x12a   : > { %v475_v37 = vrot.slane %v474_v35, 1 }
 0x12b   : > { %v469_v39 = vadd.f32 %v468_v36, %v467_v34 }
 0x12c   : > { %v476_v40 = vadd.f32 %v475_v37, %v474_v35 }
 0x12d   : > { %v478_v41 = vadd.f32 %v477_v38, %v469_v39 }
 0x12e   : > { %v479_v42 = vadd.f32 %v477_v38, %v476_v40 }
 0x130   : > { %v480_v43 = vmax.f32 %v478_v41, %v479_v42 }
 0x132   : > { %481 = vmax.xlane.f32.xlu0 %v480_v43 }
 0x1bf   : > { %v482_v44 = vpop.xlane.xlu0 %481 }
 0x1c0   : > { %v483_v45 = vsub.f32 %v478_v41, %v482_v44  ;;  %v484_v46 = vsub.f32 %v479_v42, %v482_v44 }
 0x1c2   : > { %v485_v47 = vmul.f32 1.442695, %v483_v45  ;;  %v487_v48 = vmul.f32 1.442695, %v484_v46 }
 0x1c4   : > { %762 = vpow2.f32 %v485_v47 }
 0x1c5   : > { %764 = vpow2.f32 %v487_v48 }
 0x1ce   : > { %v763_v49 = vpop.eup %762 }
 0x1cf   : > { %v765_v50 = vpop.eup %764 }
 0x1d0   : > { %v489_v51 = vadd.f32 %v765_v50, %v763_v49 }
 0x1d2   : > { %490 = vadd.xlane.f32.xlu1 %v489_v51 }
 0x25f   : > { %v491_v52 = vpop.xlane.xlu1 %490 }
 0x260   : > { %766 = vrcp.f32 %v491_v52 }
 0x26a   : > { %v767_v61 = vpop.eup %766 }
 0x26b   : > { %v493_v63 = vmul.f32 %v767_v61, %v763_v49  ;;  %v494_v0 = vmul.f32 %v767_v61, %v765_v50 }
 0x26d   : > { %v495_v2 = vmul.f32 %v493_v63, %v1048_v12  ;;  %v496_v3 = vmul.f32 %v494_v0, %v1051_v15  ;;  %v701_v4 = vpack.c.bf16 %v494_v0, %v493_v63 }
 0x26f   : > { %v699_v6 = vpack.c.bf16 %v496_v3, %v495_v2  ;;  %v534_v7 = vrot.slane %v701_v4, %v533_v62 }
 0x271   : > { %v541_v9 = vrot.slane %v534_v7, %v533_v62  ;;  %v508_v10 = vrot.slane %v699_v6, %v507_v5 }
 0x273   : > { %v509_v11 = vcombine.high %v508_v10, %v508_v10  ;;  %v550_v12 = vsel %vm548_vm13, %v541_v9, %v549_v8  ;;  %v700_v13 = vrot.slane %v508_v10, 9 }
 0x274   : > { %551 = vst [vmem:[%s326_s12] sm:$0x3] %v550_v12 }
 0x275   : > { %v519_v14 = vrot.slane %v509_v11, 7 }
 0x277   : > { %v520_v15 = vsel %vm516_vm0, %v700_v13, %v519_v14 }
 0x278   : > { %522 = vst [vmem:[%s311_s17] sm:$0xf] %v520_v15 }
 0x279   : > { %811 = shalt.err (!%p808_p5)
}
 0x27a   : > { %s812_s30 = scalar_lea.hbm %s1076_s19, 64  ;;  %s816_s25 = scalar_lea.hbm %s1126_s6, 128 }
 0x27b   : > { %p813_p8 = scmp.ne.s32.totalorder %s1076_s19, %s812_s30  ;;  %p817_p1 = scmp.lt.u32.totalorder %s1076_s19, %s1126_s6 }
 0x27c   : > { %p818_p3 = scmp.lt.u32.totalorder %s816_s25, %s812_s30  ;;  %p820_p6 = scmp.lt.u32.totalorder %s812_s30, %s1076_s19 }
 0x27d   : > { %p814_p9 = pnand %p813_p8, %p1138_p12 }
 0x27e   : > { %p819_p11 = por %p818_p3, %p817_p1 }
 0x27f   : > { %p815_p0 = pneg %p814_p9 }
 0x280   : > { %p821_p13 = por %p820_p6, %p819_p11 }
 0x282   : > { %p822_p7 = pnand %p821_p13, %p815_p0 }
 0x284   : > { %825 = shalt.err (!%p822_p7)
}
 0x285   : > { %712 = dma.vmem_to_hbm [thread:$0]  (%p1138_p12), %s1078_s13, 64, %s1076_s19, %s553_s5  }
 0x286 PF: > { %s586_s17 = sand.u32 1, %s852_s26   ;;  %p1139_p10 = scmp.ne.s32.totalorder %s1132_s15, 0 }
 0x287   : > { %p1140_p2 = scmp.ge.s32.totalorder %s864_s29, 2  ;;  %s587_s18 = scalar_lea.sflag [#allocation5], %s586_s17 }
 0x289   : > { %p719_p4 = pnand %p1140_p2, %p1139_p10 }
 0x28b   : > { %847 = dma.done.wait (!%p719_p4), %s587_s18, 64  }
 0x28c   : > { %849 = vsyncadd (!%p719_p4), %s587_s18, 4294967232  ;;  %p22_p5 = scmp.ge.s32.totalorder %s939_s8, 4   ;;  %s1141_s26 = smov %s856_s27 }
 0x28d   : > { %s1142_s27 = smov %s860_s28  ;;  %s1143_s28 = smov %s951_s11 }
 0x28e   : > { %s1144_s29 = smov %s939_s8  ;;  %24 = sbr.rel (!%p22_p5) target bundleno = 7 (0x7), region = 104 }
 0x295   :  { %599 = vsyncpa [#allocation4], 1 }
 0x296   :  { %601 = vsyncpa [#allocation4 + $0x1], 1 }
 0x297   :  { %602 = vsyncpa [#allocation5], 1 }
 0x298   :  { %604 = vsyncpa [#allocation5 + $0x1], 1 }

</bundles_post_ra>
